<compile_context>
chip_gen: v5e
topology: v5e:2x2
jax: 0.10.0
libtpu: 0.0.40
codegen_flags: <defaults>
</compile_context>

<pallas_src>
import functools

import jax
import jax.numpy as jnp
from jax import lax
from jax.experimental import pallas as pl
from jax.experimental.pallas import tpu as pltpu


_W_RESIDENT_BYTES = 36 * 1024 * 1024   # keep weight un-tiled below this (double-buffered)
_VMEM_BUDGET = 44 * 1024 * 1024        # target total VMEM for all blocks + scratch
_VMEM_CAP = 64 * 1024 * 1024           # never request more than v7x physical VMEM
_ROW_TILE_CAP = 512                    # max rows per MXU tile


def _round_up(x, m):
    return (x + m - 1) // m * m


def _largest_k_tile(nf_p, cap=2048, quantum=128):
    """Largest multiple-of-128 divisor of nf_p that is <= cap (nf_p % 128 == 0)."""
    best = quantum
    t = quantum
    while t <= min(cap, nf_p):
        if nf_p % t == 0:
            best = t
        t += quantum
    return best


def _pick_row_tile(m, tk, tw_p, x_is, w_is, o_is, with_scratch):
    """Largest multiple-of-8 row tile (<= _ROW_TILE_CAP, <= floor(m/8)*8) whose
    double-buffered blocks + scratch fit the VMEM budget.  The grid uses pl.cdiv,
    so the tile does not need to divide m (Pallas pads the trailing block and
    drops out-of-range rows on writeback)."""
    if m <= 8:
        return m
    cap = min(_ROW_TILE_CAP, max(8, (m // 8) * 8))
    w_bytes = 2 * tw_p * tk * w_is
    best = 8
    t = 8
    while t <= cap:
        need = (2 * t * tk * x_is + 2 * t * tw_p * o_is
                + (t * tw_p * 4 if with_scratch else 0) + w_bytes)
        if need <= _VMEM_BUDGET:
            best = t
        t += 8
    return best


def _vmem_limit_bytes(tm, tk, tw_p, x_is, w_is, o_is, with_scratch):
    need = (2 * tm * tk * x_is + 2 * tw_p * tk * w_is + 2 * tm * tw_p * o_is
            + (tm * tw_p * 4 if with_scratch else 0) + 2 * tw_p * 4)
    return int(min(max(need + (8 << 20), 32 << 20), _VMEM_CAP))


# --------------------------------------------------------------------------- #
# Kernels
# --------------------------------------------------------------------------- #
def _linear_kernel_single(x_ref, w_ref, b_ref, o_ref):
    """Single K block: o = x @ W^T + b.
    x_ref: (tm, nf_p)  w_ref: (1, tw_p, nf_p)  b_ref: (1, 1, tw_p)  o_ref: (tm, tw_p)."""
    acc = lax.dot_general(
        x_ref[...], w_ref[0],
        dimension_numbers=(((1,), (1,)), ((), ())),
        preferred_element_type=jnp.float32,
    )
    o_ref[...] = (acc + b_ref[0]).astype(o_ref.dtype)


def _linear_kernel_acc(k_axis, x_ref, w_ref, b_ref, o_ref, acc_ref):
    """K-tiled variant: accumulate (tm, tk) x (tw_p, tk) tiles over the K grid axis.
    x_ref: (tm, tk)  w_ref: (1, tw_p, tk)  b_ref: (1, 1, tw_p)
    o_ref: (tm, tw_p)  acc_ref: (tm, tw_p) f32 scratch."""
    k = pl.program_id(k_axis)

    @pl.when(k == 0)
    def _init():
        acc_ref[...] = jnp.zeros_like(acc_ref)

    acc_ref[...] += lax.dot_general(
        x_ref[...], w_ref[0],
        dimension_numbers=(((1,), (1,)), ((), ())),
        preferred_element_type=jnp.float32,
    )

    @pl.when(k == pl.num_programs(k_axis) - 1)
    def _finalize():
        o_ref[...] = (acc_ref[...] + b_ref[0]).astype(o_ref.dtype)


# --------------------------------------------------------------------------- #
# pallas_call wrappers
# --------------------------------------------------------------------------- #
def _shared_linear(x2, w3, b3, tm, tk, tw_p, out_dtype, flops, bytes_accessed):
    """x2: (M, nf_p), w3: (1, tw_p, nf_p), b3: (1, 1, tw_p) -> (M, tw_p)."""
    M, nf_p = x2.shape
    m_blocks = pl.cdiv(M, tm)
    k_blocks = nf_p // tk
    x_is, w_is = x2.dtype.itemsize, w3.dtype.itemsize
    o_is = jnp.dtype(out_dtype).itemsize
    cost = pl.CostEstimate(flops=flops, transcendentals=0,
                           bytes_accessed=bytes_accessed)

    if k_blocks == 1:
        return pl.pallas_call(
            _linear_kernel_single,
            out_shape=jax.ShapeDtypeStruct((M, tw_p), out_dtype),
            grid=(m_blocks,),
            in_specs=[
                pl.BlockSpec((tm, nf_p), lambda m: (m, 0)),
                pl.BlockSpec((1, tw_p, nf_p), lambda m: (0, 0, 0)),   # resident
                pl.BlockSpec((1, 1, tw_p), lambda m: (0, 0, 0)),
            ],
            out_specs=pl.BlockSpec((tm, tw_p), lambda m: (m, 0)),
            compiler_params=pltpu.CompilerParams(
                dimension_semantics=("parallel",),
                vmem_limit_bytes=_vmem_limit_bytes(
                    tm, nf_p, tw_p, x_is, w_is, o_is, False),
            ),
            cost_estimate=cost,
        )(x2, w3, b3)

    kernel = functools.partial(_linear_kernel_acc, 1)
    return pl.pallas_call(
        kernel,
        out_shape=jax.ShapeDtypeStruct((M, tw_p), out_dtype),
        grid=(m_blocks, k_blocks),
        in_specs=[
            pl.BlockSpec((tm, tk), lambda m, k: (m, k)),
            pl.BlockSpec((1, tw_p, tk), lambda m, k: (0, 0, k)),
            pl.BlockSpec((1, 1, tw_p), lambda m, k: (0, 0, 0)),
        ],
        out_specs=pl.BlockSpec((tm, tw_p), lambda m, k: (m, 0)),
        scratch_shapes=[pltpu.VMEM((tm, tw_p), jnp.float32)],
        compiler_params=pltpu.CompilerParams(
            dimension_semantics=("parallel", "arbitrary"),
            vmem_limit_bytes=_vmem_limit_bytes(
                tm, tk, tw_p, x_is, w_is, o_is, True),
        ),
        cost_estimate=cost,
    )(x2, w3, b3)


def _individual_linear(x2, w3, b3, n_vars, nf_p, tb, tk, tw_p, out_dtype,
                       flops, bytes_accessed):
    """x2: (B, n_vars*nf_p), w3: (n_vars, tw_p, nf_p), b3: (n_vars, 1, tw_p)
    -> (B, n_vars*tw_p).  Per-variable column window is selected via index_map
    only (no HBM transpose of x or of the output)."""
    B = x2.shape[0]
    b_blocks = pl.cdiv(B, tb)
    k_blocks = nf_p // tk
    x_is, w_is = x2.dtype.itemsize, w3.dtype.itemsize
    o_is = jnp.dtype(out_dtype).itemsize
    cost = pl.CostEstimate(flops=flops, transcendentals=0,
                           bytes_accessed=bytes_accessed)

    if k_blocks == 1:
        return pl.pallas_call(
            _linear_kernel_single,
            out_shape=jax.ShapeDtypeStruct((B, n_vars * tw_p), out_dtype),
            grid=(n_vars, b_blocks),
            in_specs=[
                pl.BlockSpec((tb, nf_p), lambda v, m: (m, v)),
                pl.BlockSpec((1, tw_p, nf_p), lambda v, m: (v, 0, 0)),
                pl.BlockSpec((1, 1, tw_p), lambda v, m: (v, 0, 0)),
            ],
            out_specs=pl.BlockSpec((tb, tw_p), lambda v, m: (m, v)),
            compiler_params=pltpu.CompilerParams(
                dimension_semantics=("parallel", "parallel"),
                vmem_limit_bytes=_vmem_limit_bytes(
                    tb, nf_p, tw_p, x_is, w_is, o_is, False),
            ),
            cost_estimate=cost,
        )(x2, w3, b3)

    kernel = functools.partial(_linear_kernel_acc, 2)
    return pl.pallas_call(
        kernel,
        out_shape=jax.ShapeDtypeStruct((B, n_vars * tw_p), out_dtype),
        grid=(n_vars, b_blocks, k_blocks),
        in_specs=[
            pl.BlockSpec((tb, tk), lambda v, m, k: (m, v * k_blocks + k)),
            pl.BlockSpec((1, tw_p, tk), lambda v, m, k: (v, 0, k)),
            pl.BlockSpec((1, 1, tw_p), lambda v, m, k: (v, 0, 0)),
        ],
        out_specs=pl.BlockSpec((tb, tw_p), lambda v, m, k: (m, v)),
        scratch_shapes=[pltpu.VMEM((tb, tw_p), jnp.float32)],
        compiler_params=pltpu.CompilerParams(
            dimension_semantics=("parallel", "parallel", "arbitrary"),
            vmem_limit_bytes=_vmem_limit_bytes(
                tb, tk, tw_p, x_is, w_is, o_is, True),
        ),
        cost_estimate=cost,
    )(x2, w3, b3)


# --------------------------------------------------------------------------- #
# Public forward
# --------------------------------------------------------------------------- #
@functools.partial(jax.jit, static_argnames=("individual",))
def flatten_head_forward(x, weight, bias, individual):
    """x: (B, n_vars, d_model, patch_num).

    individual=False: weight (tw, nf), bias (tw,)
    individual=True : weight (n_vars, tw, nf), bias (n_vars, tw)
    returns (B, n_vars, tw).  head_dropout is identity (eval mode).
    """
    B, n_vars, d_model, patch_num = x.shape
    nf = d_model * patch_num
    out_dtype = jnp.result_type(x.dtype, weight.dtype)
    x_is = x.dtype.itemsize
    w_is = weight.dtype.itemsize
    o_is = jnp.dtype(out_dtype).itemsize

    if not individual:
        tw = weight.shape[0]
        tw_p = _round_up(tw, 128)
        M = B * n_vars
        x2 = x.reshape(M, nf)                      # free (row-major contiguous)
        w = weight
        b = bias
        if tw_p != tw:                             # lane-dense output padding
            w = jnp.pad(w, ((0, tw_p - tw), (0, 0)))
            b = jnp.pad(b, (0, tw_p - tw))

        if 2 * tw_p * nf * w_is <= _W_RESIDENT_BYTES:
            nf_p, tk = nf, nf                      # single K block, weight resident
        else:
            nf_p = _round_up(nf, 128)
            if nf_p != nf:
                x2 = jnp.pad(x2, ((0, 0), (0, nf_p - nf)))
                w = jnp.pad(w, ((0, 0), (0, nf_p - nf)))
            tk = _largest_k_tile(nf_p)

        w3 = w.reshape(1, tw_p, nf_p)
        b3 = b.reshape(1, 1, tw_p)
        tm = _pick_row_tile(M, tk, tw_p, x_is, w_is, o_is,
                            with_scratch=(tk != nf_p))

        flops = 2 * M * nf * tw
        bytes_accessed = (x2.size * x_is + w3.size * w_is
                          + b3.size * b3.dtype.itemsize + M * tw_p * o_is)
        out2 = _shared_linear(x2, w3, b3, tm, tk, tw_p, out_dtype,
                              flops, bytes_accessed)
        if tw_p != tw:
            out2 = out2[:, :tw]
        return out2.reshape(B, n_vars, tw)

    else:
        tw = weight.shape[1]
        tw_p = _round_up(tw, 128)
        nf_p = _round_up(nf, 128)
        x3 = x.reshape(B, n_vars, nf)              # free
        w = weight
        b = bias
        if tw_p != tw:
            w = jnp.pad(w, ((0, 0), (0, tw_p - tw), (0, 0)))
            b = jnp.pad(b, ((0, 0), (0, tw_p - tw)))
        if nf_p != nf:                             # keep K-block lane alignment
            x3 = jnp.pad(x3, ((0, 0), (0, 0), (0, nf_p - nf)))
            w = jnp.pad(w, ((0, 0), (0, 0), (0, nf_p - nf)))
        x2 = x3.reshape(B, n_vars * nf_p)          # free
        b3 = b.reshape(n_vars, 1, tw_p)

        if 2 * tw_p * nf_p * w_is <= _W_RESIDENT_BYTES:
            tk = nf_p                              # per-variable weight stays resident
        else:
            tk = _largest_k_tile(nf_p)
        tb = _pick_row_tile(B, tk, tw_p, x_is, w_is, o_is,
                            with_scratch=(tk != nf_p))

        flops = 2 * B * n_vars * nf * tw
        bytes_accessed = (x2.size * x_is + w.size * w_is
                          + b3.size * b3.dtype.itemsize + B * n_vars * tw_p * o_is)
        out2 = _individual_linear(x2, w, b3, n_vars, nf_p, tb, tk, tw_p,
                                  out_dtype, flops, bytes_accessed)
        out = out2.reshape(B, n_vars, tw_p)
        if tw_p != tw:
            out = out[..., :tw]
        return out
        # TODO(synk): head_dropout (train-mode RNG masking) not implemented; forward
        # here matches eval mode where Dropout is the identity.


# --------------------------------------------------------------------------- #
# Reference + tests
# --------------------------------------------------------------------------- #
def _reference(x, weight, bias, individual):
    B, n_vars, d_model, patch_num = x.shape
    nf = d_model * patch_num
    x_flat = x.reshape(B, n_vars, nf)
    if individual:
        y = jnp.einsum("bvn,vtn->bvt", x_flat, weight,
                       precision=jax.lax.Precision.HIGHEST)
        return y + bias[None, :, :]
    else:
        y = jnp.einsum("bvn,tn->bvt", x_flat, weight,
                       precision=jax.lax.Precision.HIGHEST)
        return y + bias[None, None, :]


def _check(y, ref, atol=1e-3, rtol=1e-3):
    assert y.shape == ref.shape, (y.shape, ref.shape)
    assert jnp.allclose(y, ref, atol=atol, rtol=rtol), float(jnp.max(jnp.abs(y - ref)))


if __name__ == "__main__":
    key = jax.random.PRNGKey(0)

    # --- 1. Base shapes (nf and tw_p aligned; single-K resident path) ---------
    B, n_vars, d_model, patch_num = 2, 4, 16, 8          # nf = 128
    target_window = 32
    k_x, k_w, k_b, k_wi, k_bi = jax.random.split(key, 5)
    x = jax.random.normal(k_x, (B, n_vars, d_model, patch_num), jnp.float32)
    w_shared = jax.random.normal(k_w, (target_window, d_model * patch_num), jnp.float32) * 0.05
    b_shared = jax.random.normal(k_b, (target_window,), jnp.float32) * 0.05
    w_indiv = jax.random.normal(k_wi, (n_vars, target_window, d_model * patch_num), jnp.float32) * 0.05
    b_indiv = jax.random.normal(k_bi, (n_vars, target_window), jnp.float32) * 0.05

    y = flatten_head_forward(x, w_shared, b_shared, individual=False)
    jax.block_until_ready(y)
    _check(y, _reference(x, w_shared, b_shared, False))

    y = flatten_head_forward(x, w_indiv, b_indiv, individual=True)
    jax.block_until_ready(y)
    _check(y, _reference(x, w_indiv, b_indiv, True))

    # --- 2. Odd sizes (nf, tw not multiples of 128; padding / full-extent) ----
    B2, nv2, dm2, pn2, tw2 = 2, 3, 12, 5, 40             # nf = 60
    xs = jax.random.normal(jax.random.PRNGKey(1), (B2, nv2, dm2, pn2), jnp.float32)
    ws = jax.random.normal(jax.random.PRNGKey(2), (tw2, dm2 * pn2), jnp.float32) * 0.05
    bs = jax.random.normal(jax.random.PRNGKey(3), (tw2,), jnp.float32) * 0.05
    wi = jax.random.normal(jax.random.PRNGKey(4), (nv2, tw2, dm2 * pn2), jnp.float32) * 0.05
    bi = jax.random.normal(jax.random.PRNGKey(5), (nv2, tw2), jnp.float32) * 0.05
    y2s = flatten_head_forward(xs, ws, bs, individual=False)
    y2i = flatten_head_forward(xs, wi, bi, individual=True)
    jax.block_until_ready((y2s, y2i))
    _check(y2s, _reference(xs, ws, bs, False))
    _check(y2i, _reference(xs, wi, bi, True))

    # --- 3. Multiple row tiles with a partial tail block (cdiv grid path) -----
    B3, nv3, dm3, pn3, tw3 = 3, 7, 20, 8, 96             # M = 21, nf = 160
    x3 = jax.random.normal(jax.random.PRNGKey(6), (B3, nv3, dm3, pn3), jnp.float32)
    w3s = jax.random.normal(jax.random.PRNGKey(7), (tw3, dm3 * pn3), jnp.float32) * 0.05
    b3s = jax.random.normal(jax.random.PRNGKey(8), (tw3,), jnp.float32) * 0.05
    w3i = jax.random.normal(jax.random.PRNGKey(9), (nv3, tw3, dm3 * pn3), jnp.float32) * 0.05
    b3i = jax.random.normal(jax.random.PRNGKey(10), (nv3, tw3), jnp.float32) * 0.05
    y3s = flatten_head_forward(x3, w3s, b3s, individual=False)
    y3i = flatten_head_forward(x3, w3i, b3i, individual=True)
    jax.block_until_ready((y3s, y3i))
    _check(y3s, _reference(x3, w3s, b3s, False))
    _check(y3i, _reference(x3, w3i, b3i, True))

    # --- 4. Large weight: exercises K-tiled accumulator kernel ----------------
    B4, nv4, dm4, pn4, tw4 = 16, 2, 64, 100, 720          # nf = 6400, W ~ 18.4 MiB
    x4 = jax.random.normal(jax.random.PRNGKey(11), (B4, nv4, dm4, pn4), jnp.float32)
    w4s = jax.random.normal(jax.random.PRNGKey(12), (tw4, dm4 * pn4), jnp.float32) * 0.02
    b4s = jax.random.normal(jax.random.PRNGKey(13), (tw4,), jnp.float32) * 0.02
    w4i = jax.random.normal(jax.random.PRNGKey(14), (nv4, tw4, dm4 * pn4), jnp.float32) * 0.02
    b4i = jax.random.normal(jax.random.PRNGKey(15), (nv4, tw4), jnp.float32) * 0.02
    y4s = flatten_head_forward(x4, w4s, b4s, individual=False)
    y4i = flatten_head_forward(x4, w4i, b4i, individual=True)
    jax.block_until_ready((y4s, y4i))
    _check(y4s, _reference(x4, w4s, b4s, False), atol=2e-3, rtol=2e-3)
    _check(y4i, _reference(x4, w4i, b4i, True), atol=2e-3, rtol=2e-3)

    print("KERNEL_OK")
</pallas_src>

<mosaic_0001>
module attributes {stable_mosaic.version = 11 : i64} {
  func.func @_linear_kernel_single(%arg0: i32, %arg1: memref<8x128xf32, #tpu.memory_space<vmem>>, %arg2: memref<1x128x128xf32, #tpu.memory_space<vmem>>, %arg3: memref<1x1x128xf32, #tpu.memory_space<vmem>>, %arg4: memref<8x128xf32, #tpu.memory_space<vmem>>) attributes {dimension_semantics = [#tpu.dimension_semantics<parallel>], iteration_bounds = array<i64: 1>, scalar_prefetch = 0 : i64, scratch_operands = 0 : i64, tpu.core_type = #tpu.core_type<tc>, window_params = [{transform_indices = @transform_0, window_bounds = array<i64: 8, 128>}, {pipeline_mode = #tpu.pipeline_mode<synchronous>, transform_indices = @transform_1, window_bounds = array<i64: 1, 128, 128>}, {pipeline_mode = #tpu.pipeline_mode<synchronous>, transform_indices = @transform_2, window_bounds = array<i64: 1, 1, 128>}, {transform_indices = @transform_3, window_bounds = array<i64: 8, 128>}]} {
    %c0 = arith.constant 0 : index
    %c0_0 = arith.constant 0 : index
    %0 = vector.load %arg1[%c0, %c0_0] : memref<8x128xf32, #tpu.memory_space<vmem>>, vector<8x128xf32>
    %c0_1 = arith.constant 0 : index
    %c0_2 = arith.constant 0 : index
    %c0_3 = arith.constant 0 : index
    %1 = vector.load %arg2[%c0_1, %c0_2, %c0_3] : memref<1x128x128xf32, #tpu.memory_space<vmem>>, vector<1x128x128xf32>
    %2 = vector.shape_cast %1 : vector<1x128x128xf32> to vector<128x128xf32>
    %cst = arith.constant dense<0.000000e+00> : vector<8x128xf32>
    %3 = tpu.matmul %0, %2, %cst {dimension_numbers = #tpu.dot_dimension_numbers<[1], [1], [0], [0], [0, 0, 1, 0], [], []>} : vector<8x128xf32>, vector<128x128xf32>, vector<8x128xf32> -> vector<8x128xf32>
    %c0_4 = arith.constant 0 : index
    %c0_5 = arith.constant 0 : index
    %c0_6 = arith.constant 0 : index
    %4 = vector.load %arg3[%c0_4, %c0_5, %c0_6] : memref<1x1x128xf32, #tpu.memory_space<vmem>>, vector<1x1x128xf32>
    %5 = vector.shape_cast %4 : vector<1x1x128xf32> to vector<1x128xf32>
    %6 = vector.broadcast %5 : vector<1x128xf32> to vector<8x128xf32>
    %7 = arith.addf %3, %6 : vector<8x128xf32>
    %c0_7 = arith.constant 0 : index
    %c0_8 = arith.constant 0 : index
    %8 = vector.load %arg4[%c0_7, %c0_8] : memref<8x128xf32, #tpu.memory_space<vmem>>, vector<8x128xf32>
    tpu.vector_store %arg4[%c0_7, %c0_8], %7 {strides = array<i32>} : memref<8x128xf32, #tpu.memory_space<vmem>>, vector<8x128xf32>,
    return
  }
  func.func @transform_0(%arg0: i32) -> (i32, i32) {
    %c0_i32 = arith.constant 0 : i32
    %c0_i32_0 = arith.constant 0 : i32
    return %arg0, %c0_i32 : i32, i32
  }
  func.func @transform_1(%arg0: i32) -> (i32, i32, i32) {
    %c0_i32 = arith.constant 0 : i32
    %c0_i32_0 = arith.constant 0 : i32
    %c0_i32_1 = arith.constant 0 : i32
    %c0_i32_2 = arith.constant 0 : i32
    return %c0_i32, %c0_i32_0, %c0_i32_1 : i32, i32, i32
  }
  func.func @transform_2(%arg0: i32) -> (i32, i32, i32) {
    %c0_i32 = arith.constant 0 : i32
    %c0_i32_0 = arith.constant 0 : i32
    %c0_i32_1 = arith.constant 0 : i32
    %c0_i32_2 = arith.constant 0 : i32
    return %c0_i32, %c0_i32_0, %c0_i32_1 : i32, i32, i32
  }
  func.func @transform_3(%arg0: i32) -> (i32, i32) {
    %c0_i32 = arith.constant 0 : i32
    %c0_i32_0 = arith.constant 0 : i32
    return %arg0, %c0_i32 : i32, i32
  }
}

</mosaic_0001>

<bundles_post_ra>
// kernel: flatten_head_forward.1
= control target key start
LH: loop header
LB: loop body
LE: loop exit
PB: predicated region body
PF: predicated region fallthrough
CT: control target
= control target key end

     0   :  { %s179_s0 = inlined_call_operand.vmem [shape: f32[8,128], index: 0, kind: input, shape index: {}]   ;;  %s180_s1 = inlined_call_operand.vmem [shape: f32[1,128,128], index: 1, kind: input, shape index: {}]   ;;  %s181_s2 = inlined_call_operand.vmem [shape: f32[1,1,128], index: 2, kind: input, shape index: {}]   ;;  %s182_s3 = inlined_call_operand.hbm [shape: f32[8,128], index: 3, kind: output, shape index: {}]  }
   0x1   :  { %v31_v0 = vld [vmem:[%s180_s1 + $0x78] sm:$0xff]  ;;  %v30_v1 = vld [vmem:[%s180_s1 + $0x70] sm:$0xff] }
   0x2   :  { %36 = vmatpush.xpose.msra.mxu0 %v31_v0 }
   0x3   :  { %8 = vsyncpa [#allocation3], 0  ;;  %v29_v2 = vld [vmem:[%s180_s1 + $0x68] sm:$0xff]  ;;  %v28_v3 = vld [vmem:[%s180_s1 + $0x60] sm:$0xff]  ;;  %s101_s21 = smov [#allocation2]   ;;  %s64_s25 = sshll.u32 %s182_s3, 4  ;;  %s65_s25 = int_to_ptr.hbm [resolvable:$true] %s64_s25 }
   0x4   :  { %v27_v4 = vld [vmem:[%s180_s1 + $0x58] sm:$0xff]  ;;  %v26_v5 = vld [vmem:[%s180_s1 + $0x50] sm:$0xff]  ;;  %v25_v6 = vld [vmem:[%s180_s1 + $0x48] sm:$0xff]  ;;  %s62_s22 = sshll.u32 %s101_s21, 4  ;;  %s63_s22 = int_to_ptr.vmem [resolvable:$true] %s62_s22 }
   0x5   :  { %v24_v7 = vld [vmem:[%s180_s1 + $0x40] sm:$0xff]  ;;  %v23_v8 = vld [vmem:[%s180_s1 + $0x38] sm:$0xff]  ;;  %v22_v9 = vld [vmem:[%s180_s1 + $0x30] sm:$0xff] }
   0x6   :  { %37 = vmatpush.xpose.msra.mxu0 %v30_v1  ;;  %v21_v10 = vld [vmem:[%s180_s1 + $0x28] sm:$0xff]  ;;  %v20_v11 = vld [vmem:[%s180_s1 + $0x20] sm:$0xff]  ;;  %v19_v12 = vld [vmem:[%s180_s1 + $0x18] sm:$0xff] }
   0x7   :  { %v18_v13 = vld [vmem:[%s180_s1 + $0x10] sm:$0xff]  ;;  %v17_v14 = vld [vmem:[%s180_s1 + $0x8] sm:$0xff]  ;;  %v16_v15 = vld [vmem:[%s180_s1] sm:$0xff] }
   0x8   :  { %v15_v16 = vld [vmem:[%s179_s0] sm:$0xff] }
   0x9   :  { %v74_v17 = vld [vmem:[%s181_s2] ss:$0 sm:$0xff] }
   0xa   :  { %38 = vmatpush.xpose.msra.mxu0 %v29_v2 }
   0xe   :  { %39 = vmatpush.xpose.msra.mxu0 %v28_v3 }
  0x12   :  { %40 = vmatpush.xpose.msra.mxu0 %v27_v4 }
  0x16   :  { %41 = vmatpush.xpose.msra.mxu0 %v26_v5 }
  0x1a   :  { %42 = vmatpush.xpose.msra.mxu0 %v25_v6 }
  0x1e   :  { %43 = vmatpush.xpose.msra.mxu0 %v24_v7 }
  0x22   :  { %44 = vmatpush.xpose.msra.mxu0 %v23_v8 }
  0x26   :  { %45 = vmatpush.xpose.msra.mxu0 %v22_v9 }
  0x2a   :  { %46 = vmatpush.xpose.msra.mxu0 %v21_v10 }
  0x2e   :  { %47 = vmatpush.xpose.msra.mxu0 %v20_v11 }
  0x32   :  { %48 = vmatpush.xpose.msra.mxu0 %v19_v12 }
  0x36   :  { %49 = vmatpush.xpose.msra.mxu0 %v18_v13 }
  0x3a   :  { %50 = vmatpush.xpose.msra.mxu0 %v17_v14 }
  0x3e   :  { %51 = vmatpush.xpose.msra.mxu0 %v16_v15 }
  0x41   :  { %52 = vmatmul.f32.vlgmr.msra.gmra.mxu0 %v15_v16 }
  0xbe   :  { %v53_v18 = vpop.f32.mrf.mxu0 }
  0xbf   :  { %v54_v19 = vadd.f32 %v74_v17, %v53_v18 }
  0xc1   :  { %56 = vst [vmem:[#allocation2] sm:$0xff] %v54_v19 }
  0xc2   :  { %67 = dma.vmem_to_hbm [thread:$0]  %s63_s22, 128, %s65_s25, [#allocation3]  }
  0xc3   :  { %99 = dma.done.wait [#allocation3], 128  }
  0xc4   :  { %100 = vsyncadd [#allocation3], 4294967168 }
  0xc5   :  { %72 = vsyncpa [#allocation3], 1 }

</bundles_post_ra>
